<compile_context>
chip_gen: v5e
topology: v5e:2x2
jax: 0.10.0
libtpu: 0.0.40
codegen_flags: <defaults>
</compile_context>

<pallas_src>
import jax
import jax.numpy as jnp
from jax.experimental import pallas as pl
from jax.experimental.pallas import tpu as pltpu


def _mlp3_kernel(x_ref, w1_ref, b1_ref, w2_ref, b2_ref, w3_ref, b3_ref, o_ref):
    # x_ref: (TN, in_f); w*: (f_in, f_out); b*: (1, f_out) broadcast over the batch.
    # All accumulation in f32 (MXU native), cast once at the end.
    x = x_ref[...]
    h = jnp.dot(x, w1_ref[...], preferred_element_type=jnp.float32) + b1_ref[...]
    h = jnp.maximum(h, 0.0)
    h = jnp.dot(h, w2_ref[...], preferred_element_type=jnp.float32) + b2_ref[...]
    h = jnp.maximum(h, 0.0)
    o = jnp.dot(h, w3_ref[...], preferred_element_type=jnp.float32) + b3_ref[...]
    o_ref[...] = o.astype(o_ref.dtype)


def _derive_batch_tile(n, in_f, hid, out_f, dtype_bytes, vmem_budget_bytes):
    """Largest batch tile whose double-buffered x/out tiles + f32 activations fit the budget."""
    # per-row bytes: 2 bufs x (x row + out row) in input dtype + two live f32 hidden rows.
    per_row = dtype_bytes * 2 * (in_f + out_f) + 4 * 2 * hid
    tn = max(8, vmem_budget_bytes // max(per_row, 1))
    if tn >= n:
        return n                      # whole batch in one tile (block == full dim is legal)
    return max(8, (tn // 8) * 8)      # keep sublane (second-to-last) dim a multiple of 8


def net_forward(x, params, *, vmem_budget_bytes=4 * 1024 * 1024):
    """Forward of `Net` (default arch): flatten -> Linear/ReLU x2 -> Linear.

    params = (w1, b1, w2, b2, w3, b3) with w_i stored as (fan_in, fan_out)
    (i.e. already transposed relative to torch's nn.Linear weight).
    """
    w1, b1, w2, b2, w3, b3 = params
    n = x.shape[0]
    x2 = x.reshape(n, -1)                         # x.view(x.size(0), -1)
    in_f = x2.shape[1]
    hid = w1.shape[1]
    out_f = w3.shape[1]
    assert w1.shape == (in_f, hid) and w2.shape == (hid, hid) and w3.shape == (hid, out_f)

    dtype_bytes = jnp.dtype(x2.dtype).itemsize
    tn = _derive_batch_tile(n, in_f, hid, out_f, dtype_bytes, vmem_budget_bytes)
    grid = (pl.cdiv(n, tn),)

    # Biases as (1, F) rows so they broadcast along the batch (sublane) axis.
    b1r = b1.reshape(1, hid)
    b2r = b2.reshape(1, hid)
    b3r = b3.reshape(1, out_f)

    x_spec = pl.BlockSpec((tn, in_f), lambda i: (i, 0))
    w1_spec = pl.BlockSpec((in_f, hid), lambda i: (0, 0))
    b1_spec = pl.BlockSpec((1, hid), lambda i: (0, 0))
    w2_spec = pl.BlockSpec((hid, hid), lambda i: (0, 0))
    b2_spec = pl.BlockSpec((1, hid), lambda i: (0, 0))
    w3_spec = pl.BlockSpec((hid, out_f), lambda i: (0, 0))
    b3_spec = pl.BlockSpec((1, out_f), lambda i: (0, 0))
    o_spec = pl.BlockSpec((tn, out_f), lambda i: (i, 0))

    return pl.pallas_call(
        _mlp3_kernel,
        out_shape=jax.ShapeDtypeStruct((n, out_f), x2.dtype),
        grid_spec=pltpu.PrefetchScalarGridSpec(
            num_scalar_prefetch=0,
            grid=grid,
            in_specs=[x_spec, w1_spec, b1_spec, w2_spec, b2_spec, w3_spec, b3_spec],
            out_specs=o_spec,
        ),
        compiler_params=pltpu.CompilerParams(
            dimension_semantics=("parallel",),
            # Explicit scoped-VMEM request: double-buffered x/out tiles + resident
            # weights + headroom; 32 MiB is safe on v5e/v6e (128 MiB phys) and v7x (64 MiB).
            vmem_limit_bytes=32 * 1024 * 1024,
        ),
    )(x2, w1, b1r, w2, b2r, w3, b3r)


# TODO(synk): kernel is specialized to the default Net arch (n_hidden=2, i.e. 3 Linear
# layers); other n_hidden values would need a generated kernel or a layer loop.


if __name__ == "__main__":
    key = jax.random.PRNGKey(0)
    kx, k1, k2, k3, kb1, kb2, kb3 = jax.random.split(key, 7)

    # Shapes implied by the module defaults: in_size=10, hidden_size=25, out_size=10.
    batch, in_size, hidden_size, out_size = 64, 10, 25, 10

    x = jax.random.normal(kx, (batch, in_size), dtype=jnp.float32)
    # Weights stored as (fan_in, fan_out) == torch weight.T; deterministic random values.
    w1 = jax.random.normal(k1, (in_size, hidden_size), dtype=jnp.float32) * 0.3
    b1 = jax.random.normal(kb1, (hidden_size,), dtype=jnp.float32) * 0.1
    w2 = jax.random.normal(k2, (hidden_size, hidden_size), dtype=jnp.float32) * 0.3
    b2 = jax.random.normal(kb2, (hidden_size,), dtype=jnp.float32) * 0.1
    w3 = jax.random.normal(k3, (hidden_size, out_size), dtype=jnp.float32) * 0.3
    b3 = jax.random.normal(kb3, (out_size,), dtype=jnp.float32) * 0.1

    params = (w1, b1, w2, b2, w3, b3)

    out = net_forward(x, params)
    out = jax.block_until_ready(out)

    # Pure-JAX reference of the same forward pass.
    h = jnp.maximum(x.reshape(batch, -1) @ w1 + b1[None, :], 0.0)
    h = jnp.maximum(h @ w2 + b2[None, :], 0.0)
    ref = h @ w3 + b3[None, :]

    assert out.shape == ref.shape and out.dtype == ref.dtype
    assert jnp.allclose(out, ref, atol=1e-4, rtol=1e-4), float(jnp.max(jnp.abs(out - ref)))

    print("KERNEL_OK")
</pallas_src>

<mosaic_0001>
module attributes {stable_mosaic.version = 11 : i64} {
  func.func @_mlp3_kernel(%arg0: i32, %arg1: memref<64x10xf32, #tpu.memory_space<vmem>>, %arg2: memref<10x25xf32, #tpu.memory_space<vmem>>, %arg3: memref<1x25xf32, #tpu.memory_space<vmem>>, %arg4: memref<25x25xf32, #tpu.memory_space<vmem>>, %arg5: memref<1x25xf32, #tpu.memory_space<vmem>>, %arg6: memref<25x10xf32, #tpu.memory_space<vmem>>, %arg7: memref<1x10xf32, #tpu.memory_space<vmem>>, %arg8: memref<64x10xf32, #tpu.memory_space<vmem>>) attributes {dimension_semantics = [#tpu.dimension_semantics<parallel>], iteration_bounds = array<i64: 1>, scalar_prefetch = 0 : i64, scratch_operands = 0 : i64, tpu.core_type = #tpu.core_type<tc>, window_params = [{transform_indices = @transform_0, window_bounds = array<i64: 64, 10>}, {pipeline_mode = #tpu.pipeline_mode<synchronous>, transform_indices = @transform_1, window_bounds = array<i64: 10, 25>}, {pipeline_mode = #tpu.pipeline_mode<synchronous>, transform_indices = @transform_2, window_bounds = array<i64: 1, 25>}, {pipeline_mode = #tpu.pipeline_mode<synchronous>, transform_indices = @transform_3, window_bounds = array<i64: 25, 25>}, {pipeline_mode = #tpu.pipeline_mode<synchronous>, transform_indices = @transform_4, window_bounds = array<i64: 1, 25>}, {pipeline_mode = #tpu.pipeline_mode<synchronous>, transform_indices = @transform_5, window_bounds = array<i64: 25, 10>}, {pipeline_mode = #tpu.pipeline_mode<synchronous>, transform_indices = @transform_6, window_bounds = array<i64: 1, 10>}, {transform_indices = @transform_7, window_bounds = array<i64: 64, 10>}]} {
    %c0 = arith.constant 0 : index
    %c0_0 = arith.constant 0 : index
    %0 = vector.load %arg1[%c0, %c0_0] : memref<64x10xf32, #tpu.memory_space<vmem>>, vector<64x10xf32>
    %c0_1 = arith.constant 0 : index
    %c0_2 = arith.constant 0 : index
    %1 = vector.load %arg2[%c0_1, %c0_2] : memref<10x25xf32, #tpu.memory_space<vmem>>, vector<10x25xf32>
    %cst = arith.constant dense<0.000000e+00> : vector<64x25xf32>
    %2 = tpu.matmul %0, %1, %cst {dimension_numbers = #tpu.dot_dimension_numbers<[1], [0], [0], [1], [0, 0, 1, 1], [], []>} : vector<64x10xf32>, vector<10x25xf32>, vector<64x25xf32> -> vector<64x25xf32>
    %c0_3 = arith.constant 0 : index
    %c0_4 = arith.constant 0 : index
    %3 = vector.load %arg3[%c0_3, %c0_4] : memref<1x25xf32, #tpu.memory_space<vmem>>, vector<1x25xf32>
    %4 = vector.broadcast %3 : vector<1x25xf32> to vector<64x25xf32>
    %5 = arith.addf %2, %4 : vector<64x25xf32>
    %cst_5 = arith.constant 0.000000e+00 : f32
    %6 = vector.broadcast %cst_5 : f32 to vector<64x25xf32>
    %7 = arith.maximumf %5, %6 : vector<64x25xf32>
    %c0_6 = arith.constant 0 : index
    %c0_7 = arith.constant 0 : index
    %8 = vector.load %arg4[%c0_6, %c0_7] : memref<25x25xf32, #tpu.memory_space<vmem>>, vector<25x25xf32>
    %cst_8 = arith.constant dense<0.000000e+00> : vector<64x25xf32>
    %9 = tpu.matmul %7, %8, %cst_8 {dimension_numbers = #tpu.dot_dimension_numbers<[1], [0], [0], [1], [0, 0, 1, 1], [], []>} : vector<64x25xf32>, vector<25x25xf32>, vector<64x25xf32> -> vector<64x25xf32>
    %c0_9 = arith.constant 0 : index
    %c0_10 = arith.constant 0 : index
    %10 = vector.load %arg5[%c0_9, %c0_10] : memref<1x25xf32, #tpu.memory_space<vmem>>, vector<1x25xf32>
    %11 = vector.broadcast %10 : vector<1x25xf32> to vector<64x25xf32>
    %12 = arith.addf %9, %11 : vector<64x25xf32>
    %cst_11 = arith.constant 0.000000e+00 : f32
    %13 = vector.broadcast %cst_11 : f32 to vector<64x25xf32>
    %14 = arith.maximumf %12, %13 : vector<64x25xf32>
    %c0_12 = arith.constant 0 : index
    %c0_13 = arith.constant 0 : index
    %15 = vector.load %arg6[%c0_12, %c0_13] : memref<25x10xf32, #tpu.memory_space<vmem>>, vector<25x10xf32>
    %cst_14 = arith.constant dense<0.000000e+00> : vector<64x10xf32>
    %16 = tpu.matmul %14, %15, %cst_14 {dimension_numbers = #tpu.dot_dimension_numbers<[1], [0], [0], [1], [0, 0, 1, 1], [], []>} : vector<64x25xf32>, vector<25x10xf32>, vector<64x10xf32> -> vector<64x10xf32>
    %c0_15 = arith.constant 0 : index
    %c0_16 = arith.constant 0 : index
    %17 = vector.load %arg7[%c0_15, %c0_16] : memref<1x10xf32, #tpu.memory_space<vmem>>, vector<1x10xf32>
    %18 = vector.broadcast %17 : vector<1x10xf32> to vector<64x10xf32>
    %19 = arith.addf %16, %18 : vector<64x10xf32>
    %c0_17 = arith.constant 0 : index
    %c0_18 = arith.constant 0 : index
    %20 = vector.load %arg8[%c0_17, %c0_18] : memref<64x10xf32, #tpu.memory_space<vmem>>, vector<64x10xf32>
    tpu.vector_store %arg8[%c0_17, %c0_18], %19 {strides = array<i32>} : memref<64x10xf32, #tpu.memory_space<vmem>>, vector<64x10xf32>,
    return
  }
  func.func @transform_0(%arg0: i32) -> (i32, i32) {
    %c0_i32 = arith.constant 0 : i32
    %c0_i32_0 = arith.constant 0 : i32
    return %arg0, %c0_i32 : i32, i32
  }
  func.func @transform_1(%arg0: i32) -> (i32, i32) {
    %c0_i32 = arith.constant 0 : i32
    %c0_i32_0 = arith.constant 0 : i32
    %c0_i32_1 = arith.constant 0 : i32
    return %c0_i32, %c0_i32_0 : i32, i32
  }
  func.func @transform_2(%arg0: i32) -> (i32, i32) {
    %c0_i32 = arith.constant 0 : i32
    %c0_i32_0 = arith.constant 0 : i32
    %c0_i32_1 = arith.constant 0 : i32
    return %c0_i32, %c0_i32_0 : i32, i32
  }
  func.func @transform_3(%arg0: i32) -> (i32, i32) {
    %c0_i32 = arith.constant 0 : i32
    %c0_i32_0 = arith.constant 0 : i32
    %c0_i32_1 = arith.constant 0 : i32
    return %c0_i32, %c0_i32_0 : i32, i32
  }
  func.func @transform_4(%arg0: i32) -> (i32, i32) {
    %c0_i32 = arith.constant 0 : i32
    %c0_i32_0 = arith.constant 0 : i32
    %c0_i32_1 = arith.constant 0 : i32
    return %c0_i32, %c0_i32_0 : i32, i32
  }
  func.func @transform_5(%arg0: i32) -> (i32, i32) {
    %c0_i32 = arith.constant 0 : i32
    %c0_i32_0 = arith.constant 0 : i32
    %c0_i32_1 = arith.constant 0 : i32
    return %c0_i32, %c0_i32_0 : i32, i32
  }
  func.func @transform_6(%arg0: i32) -> (i32, i32) {
    %c0_i32 = arith.constant 0 : i32
    %c0_i32_0 = arith.constant 0 : i32
    %c0_i32_1 = arith.constant 0 : i32
    return %c0_i32, %c0_i32_0 : i32, i32
  }
  func.func @transform_7(%arg0: i32) -> (i32, i32) {
    %c0_i32 = arith.constant 0 : i32
    %c0_i32_0 = arith.constant 0 : i32
    return %arg0, %c0_i32 : i32, i32
  }
}

</mosaic_0001>

<bundles_post_ra>
// kernel: tpu_custom_call.1
= control target key start
LH: loop header
LB: loop body
LE: loop exit
PB: predicated region body
PF: predicated region fallthrough
CT: control target
= control target key end

     0   :  { %vm65_vm0 = vcmask 1041408   ;;  %vm40_vm1 = vcmask 80896   ;;  %vm151_vm2 = vcmask 1040384   ;;  %vm126_vm3 = vcmask 203776   ;;  %s495_s1 = inlined_call_operand.vmem [shape: f32[10,25], index: 1, kind: input, shape index: {}]   ;;  %s496_s0 = inlined_call_operand.vmem [shape: f32[64,10], index: 0, kind: input, shape index: {}]   ;;  %s497_s2 = inlined_call_operand.vmem [shape: f32[1,25], index: 2, kind: input, shape index: {}]   ;;  %s498_s3 = inlined_call_operand.vmem [shape: f32[25,25], index: 3, kind: input, shape index: {}]   ;;  %s499_s4 = inlined_call_operand.vmem [shape: f32[1,25], index: 4, kind: input, shape index: {}]   ;;  %s500_s5 = inlined_call_operand.vmem [shape: f32[25,10], index: 5, kind: input, shape index: {}]   ;;  %s501_s6 = inlined_call_operand.vmem [shape: f32[1,10], index: 6, kind: input, shape index: {}]   ;;  %s502_s7 = inlined_call_operand.vmem [shape: f32[64,10], index: 7, kind: output, shape index: {}]  }
   0x1   :  { %v35_v0 = vld [vmem:[%s495_s1 + $0x8] sm:$0x3]  ;;  %v34_v1 = vld [vmem:[%s495_s1] sm:$0xff]  ;;  %v28_v4 = vld [vmem:[%s496_s0 + $0x10] sm:$0xff] }
   0x2   :  { %292 = vmatpush.msk.msra.mxu0 %vm65_vm0, %v35_v0  ;;  %v26_v2 = vld [vmem:[%s496_s0] sm:$0xff]  ;;  %319 = vmatpush.msk.msra.mxu3 %vm65_vm0, %v35_v0  ;;  %v27_v3 = vld [vmem:[%s496_s0 + $0x8] sm:$0xff]  ;;  %v33_v5 = vld [vmem:[%s496_s0 + $0x38] sm:$0xff] }
   0x3   :  { %v121_v6 = vld [vmem:[%s498_s3 + $0x18] sm:$0x1]  ;;  %v30_v8 = vld [vmem:[%s496_s0 + $0x20] sm:$0xff]  ;;  %v31_v9 = vld [vmem:[%s496_s0 + $0x28] sm:$0xff] }
   0x4   :  { %84 = vmatpush.msra.mxu0 %v34_v1  ;;  %320 = vmatpush.msra.mxu3 %v34_v1  ;;  %v29_v7 = vld [vmem:[%s496_s0 + $0x18] sm:$0xff]  ;;  %v32_v10 = vld [vmem:[%s496_s0 + $0x30] sm:$0xff]  ;;  %v119_v12 = vld [vmem:[%s498_s3 + $0x8] sm:$0xff] }
   0x5   :  { %293 = vmatmul.msk.f32.vlgmr.msra.gmra.mxu0 %vm40_vm1, %v26_v2  ;;  %300 = vmatmul.msk.f32.vlgmr.msra.gmra.mxu3 %vm40_vm1, %v33_v5  ;;  %v120_v11 = vld [vmem:[%s498_s3 + $0x10] sm:$0xff]  ;;  %v118_v13 = vld [vmem:[%s498_s3] sm:$0xff]  ;;  %v207_v27 = vld [vmem:[%s500_s5 + $0x18] sm:$0x1] }
   0x6   :  { %301 = vmatpush.msk.msra.mxu1 %vm151_vm2, %v121_v6  ;;  %321 = vmatpush.msk.msrb.mxu3 %vm151_vm2, %v121_v6  ;;  %v329_v14 = vld [vmem:[%s497_s2] ss:$0 sm:$0xff]  ;;  %v206_v40 = vld [vmem:[%s500_s5 + $0x10] sm:$0xff]  ;;  %v205_v41 = vld [vmem:[%s500_s5 + $0x8] sm:$0xff] }
   0x7   :  { %310 = vmatpush.msk.msra.mxu2 %vm151_vm2, %v207_v27  ;;  %v204_v42 = vld [vmem:[%s500_s5] sm:$0xff] }
   0x8   :  { %168 = vmatpush.msra.mxu1 %v120_v11  ;;  %322 = vmatpush.msrb.mxu3 %v120_v11  ;;  %v330_v43 = vld [vmem:[%s499_s4] ss:$0 sm:$0xff] }
   0x9   :  { %252 = vmatpush.msra.mxu2 %v206_v40 }
   0xa   :  { %169 = vmatpush.msra.mxu1 %v119_v12  ;;  %323 = vmatpush.msrb.mxu3 %v119_v12 }
   0xb   :  { %253 = vmatpush.msra.mxu2 %v205_v41 }
   0xc   :  { %170 = vmatpush.msra.mxu1 %v118_v13  ;;  %324 = vmatpush.msrb.mxu3 %v118_v13 }
   0xd   :  { %294 = vmatmul.msk.f32.gmra.mxu0 %vm40_vm1, %v27_v3  ;;  %254 = vmatpush.msra.mxu2 %v204_v42 }
   0xe   :  { %325 = vmatpush.msk.msra.mxu3 %vm151_vm2, %v207_v27 }
  0x10   :  { %326 = vmatpush.msra.mxu3 %v206_v40 }
  0x12   :  { %327 = vmatpush.msra.mxu3 %v205_v41 }
  0x14   :  { %328 = vmatpush.msra.mxu3 %v204_v42 }
  0x15   :  { %295 = vmatmul.msk.f32.gmra.mxu0 %vm40_vm1, %v28_v4  ;;  %v331_v4 = vld [vmem:[%s501_s6] ss:$0 sm:$0xff] }
  0x1d   :  { %296 = vmatmul.msk.f32.gmra.mxu0 %vm40_vm1, %v29_v7 }
  0x25   :  { %297 = vmatmul.msk.f32.gmra.mxu0 %vm40_vm1, %v30_v8 }
  0x2d   :  { %298 = vmatmul.msk.f32.gmra.mxu0 %vm40_vm1, %v31_v9 }
  0x35   :  { %299 = vmatmul.msk.f32.gmra.mxu0 %vm40_vm1, %v32_v10 }
  0x82   :  { %v86_v15 = vpop.f32.mrf.mxu0 }
  0x83   :  { %v87_v16 = vadd.f32 %v329_v14, %v86_v15 }
  0x85   :  { %v110_v17 = vmax.f32 %v87_v16, 0.0 }
  0x87   :  { %302 = vmatmul.msk.f32.vlgmr.msra.gmra.mxu1 %vm126_vm3, %v110_v17 }
  0x88   :  { %v107_v36 = vpop.f32.mrf.mxu3 }
  0x89   :  { %v108_v38 = vadd.f32 %v329_v14, %v107_v36 }
  0x8a   :  { %v89_v18 = vpop.f32.mrf.mxu0 }
  0x8b   :  { %v90_v19 = vadd.f32 %v329_v14, %v89_v18  ;;  %v117_v39 = vmax.f32 %v108_v38, 0.0 }
  0x8d   :  { %v111_v20 = vmax.f32 %v90_v19, 0.0 }
  0x8f   :  { %303 = vmatmul.msk.f32.gmra.mxu1 %vm126_vm3, %v111_v20 }
  0x92   :  { %v92_v21 = vpop.f32.mrf.mxu0 }
  0x93   :  { %v93_v22 = vadd.f32 %v329_v14, %v92_v21 }
  0x95   :  { %v112_v23 = vmax.f32 %v93_v22, 0.0 }
  0x97   :  { %304 = vmatmul.msk.f32.gmra.mxu1 %vm126_vm3, %v112_v23 }
  0x9a   :  { %v95_v24 = vpop.f32.mrf.mxu0 }
  0x9b   :  { %v96_v25 = vadd.f32 %v329_v14, %v95_v24 }
  0x9d   :  { %v113_v26 = vmax.f32 %v96_v25, 0.0 }
  0x9f   :  { %305 = vmatmul.msk.f32.gmra.mxu1 %vm126_vm3, %v113_v26 }
  0xa2   :  { %v98_v28 = vpop.f32.mrf.mxu0 }
  0xa3   :  { %v99_v29 = vadd.f32 %v329_v14, %v98_v28 }
  0xa5   :  { %v114_v30 = vmax.f32 %v99_v29, 0.0 }
  0xa7   :  { %306 = vmatmul.msk.f32.gmra.mxu1 %vm126_vm3, %v114_v30 }
  0xaa   :  { %v101_v31 = vpop.f32.mrf.mxu0 }
  0xab   :  { %v102_v32 = vadd.f32 %v329_v14, %v101_v31 }
  0xad   :  { %v115_v33 = vmax.f32 %v102_v32, 0.0 }
  0xaf   :  { %307 = vmatmul.msk.f32.gmra.mxu1 %vm126_vm3, %v115_v33 }
  0xb2   :  { %v104_v34 = vpop.f32.mrf.mxu0 }
  0xb3   :  { %v105_v35 = vadd.f32 %v329_v14, %v104_v34 }
  0xb5   :  { %v116_v37 = vmax.f32 %v105_v35, 0.0 }
  0xb7   :  { %308 = vmatmul.msk.f32.vlgmr.msrb.gmra.mxu3 %vm126_vm3, %v116_v37 }
  0xbf   :  { %309 = vmatmul.msk.f32.gmra.mxu3 %vm126_vm3, %v117_v39 }
 0x104   :  { %v172_v44 = vpop.f32.mrf.mxu1 }
 0x105   :  { %v173_v45 = vadd.f32 %v330_v43, %v172_v44 }
 0x107   :  { %v196_v46 = vmax.f32 %v173_v45, 0.0 }
 0x109   :  { %311 = vmatmul.msk.f32.vlgmr.msra.gmra.mxu2 %vm126_vm3, %v196_v46 }
 0x10c   :  { %v175_v47 = vpop.f32.mrf.mxu1 }
 0x10d   :  { %v176_v48 = vadd.f32 %v330_v43, %v175_v47 }
 0x10f   :  { %v197_v49 = vmax.f32 %v176_v48, 0.0 }
 0x111   :  { %312 = vmatmul.msk.f32.gmra.mxu2 %vm126_vm3, %v197_v49 }
 0x114   :  { %v178_v50 = vpop.f32.mrf.mxu1 }
 0x115   :  { %v179_v51 = vadd.f32 %v330_v43, %v178_v50 }
 0x117   :  { %v198_v52 = vmax.f32 %v179_v51, 0.0 }
 0x119   :  { %313 = vmatmul.msk.f32.gmra.mxu2 %vm126_vm3, %v198_v52 }
 0x11c   :  { %v181_v53 = vpop.f32.mrf.mxu1 }
 0x11d   :  { %v182_v54 = vadd.f32 %v330_v43, %v181_v53 }
 0x11f   :  { %v199_v55 = vmax.f32 %v182_v54, 0.0 }
 0x121   :  { %314 = vmatmul.msk.f32.gmra.mxu2 %vm126_vm3, %v199_v55 }
 0x124   :  { %v184_v56 = vpop.f32.mrf.mxu1 }
 0x125   :  { %v185_v57 = vadd.f32 %v330_v43, %v184_v56 }
 0x127   :  { %v200_v58 = vmax.f32 %v185_v57, 0.0 }
 0x129   :  { %315 = vmatmul.msk.f32.gmra.mxu2 %vm126_vm3, %v200_v58 }
 0x12c   :  { %v187_v59 = vpop.f32.mrf.mxu1 }
 0x12d   :  { %v188_v60 = vadd.f32 %v330_v43, %v187_v59 }
 0x12f   :  { %v201_v61 = vmax.f32 %v188_v60, 0.0 }
 0x131   :  { %316 = vmatmul.msk.f32.gmra.mxu2 %vm126_vm3, %v201_v61 }
 0x13a   :  { %v190_v62 = vpop.f32.mrf.mxu3 }
 0x13b   :  { %v191_v63 = vadd.f32 %v330_v43, %v190_v62 }
 0x13d   :  { %v202_v0 = vmax.f32 %v191_v63, 0.0 }
 0x13f   :  { %317 = vmatmul.msk.f32.vlgmr.msra.gmra.mxu3 %vm126_vm3, %v202_v0 }
 0x142   :  { %v193_v1 = vpop.f32.mrf.mxu3 }
 0x143   :  { %v194_v2 = vadd.f32 %v330_v43, %v193_v1 }
 0x145   :  { %v203_v3 = vmax.f32 %v194_v2, 0.0 }
 0x147   :  { %318 = vmatmul.msk.f32.gmra.mxu3 %vm126_vm3, %v203_v3 }
 0x18c   :  { %v256_v5 = vpop.f32.mrf.mxu2 }
 0x18d   :  { %v257_v6 = vadd.f32 %v331_v4, %v256_v5 }
 0x18f   :  { %280 = vst.msk [vmem:[%s502_s7] sm:$0xff] %vm40_vm1, %v257_v6 }
 0x194   :  { %v259_v7 = vpop.f32.mrf.mxu2 }
 0x195   :  { %v260_v8 = vadd.f32 %v331_v4, %v259_v7 }
 0x197   :  { %281 = vst.msk [vmem:[%s502_s7 + $0x8] sm:$0xff] %vm40_vm1, %v260_v8 }
 0x19c   :  { %v262_v9 = vpop.f32.mrf.mxu2 }
 0x19d   :  { %v263_v10 = vadd.f32 %v331_v4, %v262_v9 }
 0x19f   :  { %282 = vst.msk [vmem:[%s502_s7 + $0x10] sm:$0xff] %vm40_vm1, %v263_v10 }
 0x1a4   :  { %v265_v11 = vpop.f32.mrf.mxu2 }
 0x1a5   :  { %v266_v12 = vadd.f32 %v331_v4, %v265_v11 }
 0x1a7   :  { %283 = vst.msk [vmem:[%s502_s7 + $0x18] sm:$0xff] %vm40_vm1, %v266_v12 }
 0x1ac   :  { %v268_v13 = vpop.f32.mrf.mxu2 }
 0x1ad   :  { %v269_v14 = vadd.f32 %v331_v4, %v268_v13 }
 0x1af   :  { %284 = vst.msk [vmem:[%s502_s7 + $0x20] sm:$0xff] %vm40_vm1, %v269_v14 }
 0x1b4   :  { %v271_v15 = vpop.f32.mrf.mxu2 }
 0x1b5   :  { %v272_v16 = vadd.f32 %v331_v4, %v271_v15 }
 0x1b7   :  { %285 = vst.msk [vmem:[%s502_s7 + $0x28] sm:$0xff] %vm40_vm1, %v272_v16 }
 0x1c2   :  { %v274_v17 = vpop.f32.mrf.mxu3 }
 0x1c3   :  { %v275_v18 = vadd.f32 %v331_v4, %v274_v17 }
 0x1c5   :  { %286 = vst.msk [vmem:[%s502_s7 + $0x30] sm:$0xff] %vm40_vm1, %v275_v18 }
 0x1ca   :  { %v277_v19 = vpop.f32.mrf.mxu3 }
 0x1cb   :  { %v278_v20 = vadd.f32 %v331_v4, %v277_v19 }
 0x1cd   :  { %287 = vst.msk [vmem:[%s502_s7 + $0x38] sm:$0xff] %vm40_vm1, %v278_v20 }

</bundles_post_ra>
